<compile_context>
chip_gen: v7x
topology: tpu7x:2x2x1
jax: 0.10.0
libtpu: 0.0.40
codegen_flags: <defaults>
</compile_context>

<pallas_src>
import functools

import jax
import jax.numpy as jnp
from jax.experimental import pallas as pl
from jax.experimental.pallas import tpu as pltpu


def _scale_kernel(x_ref, o_ref, *, scale):
    # x_ref: (TILE_R, LANE) uint8 block; o_ref: (TILE_R, LANE) out_dtype block.
    # u8 -> f32 convert + one VPU multiply; cast is a no-op for f32 output.
    o_ref[...] = (x_ref[...].astype(jnp.float32) * scale).astype(o_ref.dtype)


def _round_up(x, m):
    return ((x + m - 1) // m) * m


# ~1M elements per block: 1 MiB u8 in + 4 MiB f32 out per buffer,
# double-buffered => ~10 MiB VMEM. Fits v5e/v6e's 16/32 MiB scoped defaults
# and v7x's 32 MiB scoped default (64 MiB physical). Measured roofline is
# already ~85%+ at tiles this size, so prefer more grid steps over bigger
# tiles; if this is ever raised, vmem_limit_bytes below scales with it.
_TARGET_BLOCK_ELEMS = 1 << 20


def pil_to_tensor(image_hwc_uint8, div=None, *,
                  block_elems=_TARGET_BLOCK_ELEMS, out_dtype=jnp.float32):
    """JAX/Pallas equivalent of PILToTensor.forward.

    image_hwc_uint8: uint8 array (H, W, 3) -- an already-decoded RGB image.
    div: STATIC Python value (truthiness is checked at trace time; do not pass
         a traced scalar). Falsy -> returns (3, H, W) uint8 unchanged.
         Truthy -> returns (3, H, W) `out_dtype` = x / div (via multiply by a
         precomputed reciprocal; differs from torch's exact division by <=1 ulp).
    """
    # TODO(synk): PIL Image.convert(mode='RGB') (file decode / palette
    # expansion) has no Pallas equivalent; input is assumed to already be an
    # RGB uint8 HWC array.
    x_chw = jnp.transpose(image_hwc_uint8, (2, 0, 1))  # HWC -> CHW
    c, h, w = x_chw.shape

    # Mirrors the original module's `if self.div:` truthiness check
    # (div=None and div=0 both return the uint8 tensor unchanged).
    if not div:
        # Pure layout permute: a Pallas memcpy kernel would only add a full
        # extra HBM round trip, so just return the permuted tensor.
        return x_chw

    total = c * h * w

    # Lane-dense 2-D view of the contiguous CHW buffer: last dim is always a
    # multiple of 128 (full-width unmasked vst on the output). Pad the flat
    # buffer up to the lane width if needed and slice the pad off afterwards;
    # a few hundred bytes of extra DMA beats masked stores across the output.
    lane = 512 if total >= 512 else 128
    padded_total = _round_up(total, lane)
    rows = padded_total // lane

    x_flat = jnp.reshape(x_chw, (total,))  # free: CHW buffer is contiguous
    if padded_total != total:
        x_flat = jnp.pad(x_flat, (0, padded_total - total))
    x2d = jnp.reshape(x_flat, (rows, lane))

    # Row tile: multiple of 32 (uint8 sublane packing; also covers f32's 8),
    # capped by
    #   (a) the per-block VMEM budget, and
    #   (b) a pipelining target of ~8 grid steps whenever the image is large
    #       enough (also guarantees >=2 steps so v7x's two TensorCores both
    #       get blocks under dimension_semantics=("parallel",)).
    # Partial edge blocks are fine (Pallas masks them).
    budget_rows = max(32, (block_elems // lane) // 32 * 32)
    steps_cap = max(32, _round_up(pl.cdiv(rows, 8), 32))
    tile_r = min(rows, budget_rows, steps_cap)
    grid = (pl.cdiv(rows, tile_r),)

    out_dtype = jnp.dtype(out_dtype)
    scale = 1.0 / float(div)
    kernel = functools.partial(_scale_kernel, scale=scale)

    # Explicit VMEM cap: double-buffered (u8 in + out_dtype out) block plus
    # slack, clamped to a range safe on every generation (v7x physical VMEM
    # is only 64 MiB).
    block_bytes = tile_r * lane * (1 + out_dtype.itemsize)
    vmem_limit = min(max(2 * block_bytes + (2 << 20), 16 << 20), 64 << 20)

    out2d = pl.pallas_call(
        kernel,
        out_shape=jax.ShapeDtypeStruct((rows, lane), out_dtype),
        grid=grid,
        in_specs=[pl.BlockSpec((tile_r, lane), lambda r: (r, 0))],
        out_specs=pl.BlockSpec((tile_r, lane), lambda r: (r, 0)),
        compiler_params=pltpu.CompilerParams(
            dimension_semantics=("parallel",),
            allow_input_fusion=[True],
            vmem_limit_bytes=vmem_limit,
        ),
        cost_estimate=pl.CostEstimate(
            flops=padded_total,
            transcendentals=0,
            bytes_accessed=padded_total * (1 + out_dtype.itemsize),
        ),
    )(x2d)

    out_flat = jnp.reshape(out2d, (padded_total,))
    if padded_total != total:
        out_flat = out_flat[:total]
    return jnp.reshape(out_flat, (c, h, w))


if __name__ == "__main__":
    key = jax.random.PRNGKey(0)

    # --- small image: single-block div path ---------------------------------
    H, W = 16, 16
    image = jax.random.randint(
        key, (H, W, 3), 0, 256, dtype=jnp.int32).astype(jnp.uint8)

    f_div = jax.jit(lambda img: pil_to_tensor(img, div=255.0))
    out = jax.block_until_ready(f_div(image))
    ref = jnp.transpose(image, (2, 0, 1)).astype(jnp.float32) / 255.0
    assert out.shape == (3, H, W) and out.dtype == jnp.float32
    assert jnp.allclose(out, ref, atol=1e-6), "div path mismatch"

    # --- div=None path (uint8 CHW passthrough) -- PILToTensor() -------------
    f_id = jax.jit(lambda img: pil_to_tensor(img, div=None))
    out_u8 = jax.block_until_ready(f_id(image))
    ref_u8 = jnp.transpose(image, (2, 0, 1))
    assert out_u8.shape == (3, H, W) and out_u8.dtype == jnp.uint8
    assert jnp.array_equal(out_u8, ref_u8), "passthrough path mismatch"

    # --- odd-sized image: exercises the lane-pad + slice path ---------------
    H1, W1 = 17, 19  # 3*17*19 = 969, not a multiple of 128
    key1 = jax.random.fold_in(key, 1)
    image1 = jax.random.randint(
        key1, (H1, W1, 3), 0, 256, dtype=jnp.int32).astype(jnp.uint8)
    out1 = jax.block_until_ready(
        jax.jit(lambda img: pil_to_tensor(img, div=255.0))(image1))
    ref1 = jnp.transpose(image1, (2, 0, 1)).astype(jnp.float32) / 255.0
    assert out1.shape == (3, H1, W1) and out1.dtype == jnp.float32
    assert jnp.allclose(out1, ref1, atol=1e-6), "padded div path mismatch"

    # --- larger image with a tiny block budget: multi-step grid + masked
    #     partial edge block --------------------------------------------------
    H2, W2 = 96, 160
    key2 = jax.random.fold_in(key, 2)
    image2 = jax.random.randint(
        key2, (H2, W2, 3), 0, 256, dtype=jnp.int32).astype(jnp.uint8)
    f_div_tiled = jax.jit(
        lambda img: pil_to_tensor(img, div=255.0, block_elems=1 << 12))
    out2 = jax.block_until_ready(f_div_tiled(image2))
    ref2 = jnp.transpose(image2, (2, 0, 1)).astype(jnp.float32) / 255.0
    assert out2.shape == (3, H2, W2) and out2.dtype == jnp.float32
    assert jnp.allclose(out2, ref2, atol=1e-6), "tiled div path mismatch"

    # --- optional bf16 output mode -------------------------------------------
    f_bf16 = jax.jit(
        lambda img: pil_to_tensor(img, div=255.0, out_dtype=jnp.bfloat16))
    out_bf16 = jax.block_until_ready(f_bf16(image2))
    assert out_bf16.shape == (3, H2, W2) and out_bf16.dtype == jnp.bfloat16
    assert jnp.allclose(out_bf16.astype(jnp.float32), ref2, atol=1.0 / 128), \
        "bf16 div path mismatch"

    print("KERNEL_OK")
</pallas_src>

<mosaic_0001>
module attributes {stable_mosaic.version = 11 : i64} {
  func.func @_scale_kernel(%arg0: i32, %arg1: memref<2x512xi8, #tpu.memory_space<vmem>>, %arg2: memref<2x512xf32, #tpu.memory_space<vmem>>) attributes {dimension_semantics = [#tpu.dimension_semantics<parallel>], iteration_bounds = array<i64: 1>, scalar_prefetch = 0 : i64, scratch_operands = 0 : i64, tpu.core_type = #tpu.core_type<tc>, window_params = [{transform_indices = @transform_0, window_bounds = array<i64: 2, 512>}, {transform_indices = @transform_1, window_bounds = array<i64: 2, 512>}]} {
    %c0 = arith.constant 0 : index
    %c0_0 = arith.constant 0 : index
    %0 = vector.load %arg1[%c0, %c0_0] : memref<2x512xi8, #tpu.memory_space<vmem>>, vector<2x512xi8>
    %1 = arith.uitofp %0 : vector<2x512xi8> to vector<2x512xf32>
    %cst = arith.constant 0.00392156886 : f32
    %2 = vector.broadcast %cst : f32 to vector<2x512xf32>
    %3 = arith.mulf %1, %2 : vector<2x512xf32>
    %c0_1 = arith.constant 0 : index
    %c0_2 = arith.constant 0 : index
    %4 = vector.load %arg2[%c0_1, %c0_2] : memref<2x512xf32, #tpu.memory_space<vmem>>, vector<2x512xf32>
    tpu.vector_store %arg2[%c0_1, %c0_2], %3 {strides = array<i32>} : memref<2x512xf32, #tpu.memory_space<vmem>>, vector<2x512xf32>,
    return
  }
  func.func @transform_0(%arg0: i32) -> (i32, i32) {
    %c0_i32 = arith.constant 0 : i32
    %c0_i32_0 = arith.constant 0 : i32
    return %arg0, %c0_i32 : i32, i32
  }
  func.func @transform_1(%arg0: i32) -> (i32, i32) {
    %c0_i32 = arith.constant 0 : i32
    %c0_i32_0 = arith.constant 0 : i32
    return %arg0, %c0_i32 : i32, i32
  }
}

</mosaic_0001>

<bundles_post_ra>
// kernel: _lambda_.1
= control target key start
LH: loop header
LB: loop body
LE: loop exit
PB: predicated region body
PF: predicated region fallthrough
CT: control target
= control target key end

     0   :  { %v22_v0 = vlaneseq  ;;  %v41_v2 = vmov 1983009808   ;;  %s58_s0 = inlined_call_operand.vmem [shape: u8[2,512], index: 0, kind: input, shape index: {}]   ;;  %s59_s1 = inlined_call_operand.vmem [shape: f32[2,512], index: 1, kind: output, shape index: {}]  }
   0x1   :  { %v8_v1 = vld [vmem:[%s58_s0] sm:$0xf]  ;;  %v20_v3 = vunpack.c.l.s4 %v41_v2 }
   0x2   :  { %v9_v4 = vunpack.c.0.s8 %v8_v1  ;;  %v10_v5 = vunpack.c.1.s8 %v8_v1  ;;  %v23_v6 = vshrl.u32 %v22_v0, 7 }
   0x3   :  { %v21_v7 = vunpack.c.0.s8 %v20_v3 }
   0x4   :  { %v11_v8 = vand.u32 255, %v9_v4  ;;  %v12_v9 = vand.u32 255, %v10_v5 }
   0x5   :  { %v24_v12 = vsub.s32 %v21_v7, %v23_v6 }
   0x6   :  { %v13_v10 = vcvt.s32.f32 %v11_v8  ;;  %v14_v11 = vcvt.s32.f32 %v12_v9 }
   0x8   :  { %v15_v13 = vmul.f32 0.003921569, %v13_v10  ;;  %v16_v14 = vmul.f32 0.003921569, %v14_v11 }
   0xa   :  { %v25_v15 = vrot.slane %v15_v13, %v24_v12  ;;  %v32_v16 = vrot.slane %v16_v14, %v24_v12 }
   0xc   :  { %v33_v17 = vcombine.low %v25_v15, %v32_v16 }
   0xe   :  { %35 = vst [vmem:[%s59_s1] sm:$0xff] %v33_v17 }

</bundles_post_ra>
